<compile_context>
chip_gen: v7x
topology: tpu7x:2x2x1
jax: 0.10.0
libtpu: 0.0.40
codegen_flags: <defaults>
</compile_context>

<pallas_src>
import jax
import jax.numpy as jnp
from jax.experimental import pallas as pl
from jax.experimental.pallas import tpu as pltpu


def _baseline_kernel(pw_ref, b_ref, o_ref):
    # pw_ref : (2, R, 128) f32 in VMEM -- [0] = param, [1] = weight (one DMA'd operand)
    # b_ref  : (1,)        f32 in SMEM -- Linear bias
    # o_ref  : (1, 1)      f32 in VMEM
    prod = pw_ref[0] * pw_ref[1]            # VPU elementwise (one vreg at D=1024)
    out = jnp.sum(prod) + b_ref[0]          # XLU cross-lane/sublane reduce + SMEM scalar
    # activation = Identity -> no-op
    o_ref[...] = jnp.reshape(out, (1, 1))


def pack_baseline_params(param, weight, bias):
    """One-time repack into the kernel storage layout.

    Run at init / checkpoint load, NOT per step.  Keeps the original (1, D)
    arrays only as API-compat views; the kernel consumes the packed form.

    Returns:
      packed_pw : (2, R, 128) f32 -- [0] = param, [1] = weight, zero-padded to a
                  multiple of 128 lanes (padding contributes 0 to the dot).
      bias1     : (1,) f32
    """
    assert param.ndim == 2 and param.shape[0] == 1
    assert weight.shape == param.shape
    D = param.shape[1]
    pad = (-D) % 128
    if pad:
        param = jnp.pad(param, ((0, 0), (0, pad)))
        weight = jnp.pad(weight, ((0, 0), (0, pad)))
    Dp = D + pad
    R = Dp // 128
    packed_pw = jnp.stack(
        [param.reshape(R, 128), weight.reshape(R, 128)], axis=0
    ).astype(jnp.float32)                                   # (2, R, 128), vreg-dense
    bias1 = jnp.reshape(bias, (1,)).astype(jnp.float32)     # f32 cast hoisted to init (v5e)
    return packed_pw, bias1


def parametric_baseline(packed_pw, bias):
    """packed_pw: (2, R, 128) f32 from pack_baseline_params; bias: (1,) f32."""
    two, R, L = packed_pw.shape
    assert two == 2 and L == 128
    Dp = R * 128

    return pl.pallas_call(
        _baseline_kernel,
        out_shape=jax.ShapeDtypeStruct((1, 1), jnp.float32),
        in_specs=[
            pl.BlockSpec(memory_space=pltpu.MemorySpace.VMEM),   # packed param+weight
            pl.BlockSpec(memory_space=pltpu.MemorySpace.SMEM),   # bias (1,)
        ],
        out_specs=pl.BlockSpec(memory_space=pltpu.MemorySpace.VMEM),
        cost_estimate=pl.CostEstimate(
            flops=2 * Dp, bytes_accessed=8 * Dp + 8, transcendentals=0
        ),
    )(packed_pw, bias)


def init_params(key, param_dim=1024, bias_init=0.0):
    k_param, k_w = jax.random.split(key)
    # nn.Parameter(torch.randn(1, param_dim))
    param = jax.random.normal(k_param, (1, param_dim), dtype=jnp.float32)
    # init_selu -> LeCun normal: std = 1 / sqrt(fan_in)
    w = jax.random.normal(k_w, (1, param_dim), dtype=jnp.float32) / jnp.sqrt(
        jnp.float32(param_dim)
    )
    b = jnp.full((1,), bias_init, dtype=jnp.float32)
    return param, w, b


if __name__ == "__main__":
    key = jax.random.PRNGKey(0)
    param_dim = 1024  # module default; packs to exactly one (8,128) f32 vreg per operand

    # --- init / checkpoint-load time: create params and repack ONCE ---
    param, w, b = init_params(key, param_dim=param_dim, bias_init=0.0)
    packed_pw, b1 = pack_baseline_params(param, w, b)

    # --- per-step: single pallas_call on the pre-packed storage ---
    out = parametric_baseline(packed_pw, b1)
    out = jax.block_until_ready(out)

    # Pure-JAX reference (Linear: param @ W^T + b, identity activation).
    ref = param @ w.T + b[None, :]
    assert out.shape == (1, 1)
    assert jnp.allclose(out, ref, atol=1e-5, rtol=1e-5), (out, ref)

    print("KERNEL_OK")
</pallas_src>

<mosaic_0001>
module attributes {stable_mosaic.version = 11 : i64} {
  func.func @_baseline_kernel(%arg0: memref<2x8x128xf32, #tpu.memory_space<vmem>>, %arg1: memref<1xf32, #tpu.memory_space<smem>>, %arg2: memref<1x1xf32, #tpu.memory_space<vmem>>) attributes {dimension_semantics = [], scalar_prefetch = 0 : i64, scratch_operands = 0 : i64, tpu.core_type = #tpu.core_type<tc>} {
    %c0 = arith.constant 0 : index
    %c0_0 = arith.constant 0 : index
    %c0_1 = arith.constant 0 : index
    %0 = vector.load %arg0[%c0, %c0_0, %c0_1] : memref<2x8x128xf32, #tpu.memory_space<vmem>>, vector<1x8x128xf32>
    %1 = vector.shape_cast %0 : vector<1x8x128xf32> to vector<8x128xf32>
    %c1 = arith.constant 1 : index
    %c0_2 = arith.constant 0 : index
    %c0_3 = arith.constant 0 : index
    %2 = vector.load %arg0[%c1, %c0_2, %c0_3] : memref<2x8x128xf32, #tpu.memory_space<vmem>>, vector<1x8x128xf32>
    %3 = vector.shape_cast %2 : vector<1x8x128xf32> to vector<8x128xf32>
    %4 = arith.mulf %1, %3 : vector<8x128xf32>
    %5 = vector.shape_cast %4 : vector<8x128xf32> to vector<1x8x128xf32>
    %cst = arith.constant dense<0.000000e+00> : vector<1xf32>
    %6 = vector.multi_reduction <add>, %5, %cst [1, 2] : vector<1x8x128xf32> to vector<1xf32>
    %7 = vector.shape_cast %6 : vector<1xf32> to vector<1x1x1xf32>
    %8 = vector.extract %7[0, 0, 0] : f32 from vector<1x1x1xf32>
    %c0_4 = arith.constant 0 : index
    %9 = memref.load %arg1[%c0_4] : memref<1xf32, #tpu.memory_space<smem>>
    %10 = arith.addf %8, %9 : f32
    %11 = vector.broadcast %10 : f32 to vector<1x1xf32>
    %c0_5 = arith.constant 0 : index
    %c0_6 = arith.constant 0 : index
    %12 = vector.load %arg2[%c0_5, %c0_6] : memref<1x1xf32, #tpu.memory_space<vmem>>, vector<1x1xf32>
    tpu.vector_store %arg2[%c0_5, %c0_6], %11 {strides = array<i32>} : memref<1x1xf32, #tpu.memory_space<vmem>>, vector<1x1xf32>,
    return
  }
}

</mosaic_0001>

<bundles_post_ra>
// kernel: tpu_custom_call.1
= control target key start
LH: loop header
LB: loop body
LE: loop exit
PB: predicated region body
PF: predicated region fallthrough
CT: control target
= control target key end

     0   :  { %8 = vsyncpa [#allocation4], 0  ;;  %s160_s0 = inlined_call_operand.hbm [shape: f32[2,8,128], index: 0, kind: input, shape index: {}]   ;;  %s161_s1 = inlined_call_operand.<no memory space> [shape: f32[1], index: 1, kind: input, shape index: {}]   ;;  %s162_s2 = inlined_call_operand.hbm [shape: f32[1,1], index: 2, kind: output, shape index: {}]  }
   0x1   :  { %9 = vsyncpa [#allocation5], 0  ;;  %s114_s9 = smov [#allocation3]   ;;  %s66_s13 = scalar_lea.hbm %s160_s0, 256 }
   0x2   :  { %s15_s10 = sshll.u32 %s114_s9, 4  ;;  %p67_p0 = scmp.ne.s32.totalorder %s160_s0, %s66_s13  ;;  %s16_s10 = int_to_ptr.vmem [resolvable:$true] %s15_s10 }
   0x3   :  { %p70_p1 = scmp.lt.u32.totalorder %s66_s13, %s160_s0 }
   0x5   :  { %p72_p2 = pnand %p70_p1, %p67_p0 }
   0x7   :  { %75 = shalt.err (!%p72_p2)
}
   0x8   :  { %s76_s18 = scalar_lea.vmem %s16_s10, 256  ;;  %p81_p4 = scmp.lt.s32.totalorder %s16_s10, %s16_s10 }
   0x9   :  { %p77_p3 = scmp.ne.s32.totalorder %s16_s10, %s76_s18  ;;  %p82_p5 = scmp.lt.s32.totalorder %s76_s18, %s76_s18 }
   0xb   :  { %p83_p6 = por %p82_p5, %p81_p4 }
   0xd   :  { %p84_p7 = pnand %p83_p6, %p77_p3 }
   0xf   :  { %87 = shalt.err (!%p84_p7)
}
  0x10   :  { %s115_s19 = smov 128   ;;  %s116_s20 = smov 8  }
  0x11   :  { %21 = dma.hbm_to_vmem [thread:$0]  %s160_s0, 256, %s16_s10, [#allocation4], %s115_s19, %s115_s19, %s116_s20  }
  0x12   :  { %110 = dma.done.wait [#allocation4], 256  }
  0x13   :  { %111 = vsyncadd [#allocation4], 4294967040  ;;  %v27_v0 = vld [vmem:[#allocation3] sm:$0xff]  ;;  %v29_v1 = vld [vmem:[#allocation3 + $0x8] sm:$0xff]  ;;  %s117_s23 = smov [#allocation6]   ;;  %vm43_vm0 = vcmask 0  }
  0x14   :  { %v30_v2 = vmul.f32 %v29_v1, %v27_v0  ;;  %s51_s24 = sshll.u32 %s117_s23, 4  ;;  %s52_s24 = int_to_ptr.vmem [resolvable:$true] %s51_s24 }
  0x15   :  { %s88_s28 = scalar_lea.vmem %s52_s24, 16  ;;  %s92_s29 = scalar_lea.vmem %s52_s24, 32 }
  0x16   :  { %31 = vadd.xlane.f32.xlu0 %v30_v2  ;;  %p89_p8 = scmp.ne.s32.totalorder %s52_s24, %s88_s28  ;;  %p93_p9 = scmp.lt.s32.totalorder %s52_s24, %s52_s24 }
  0x17   :  { %p94_p10 = scmp.lt.s32.totalorder %s92_s29, %s88_s28 }
  0x19   :  { %p95_p11 = por %p94_p10, %p93_p9 }
  0x1b   :  { %p96_p12 = pnand %p95_p11, %p89_p8 }
  0xa3   :  { %v32_v3 = vpop.xlane.xlu0 %31 }
  0xa4   :  { %v33_v4 = vrot.slane %v32_v3, 4 }
  0xa6   :  { %v34_v5 = vadd.f32 %v33_v4, %v32_v3 }
  0xa8   :  { %v35_v6 = vrot.slane %v34_v5, 2 }
  0xaa   :  { %v36_v7 = vadd.f32 %v35_v6, %v34_v5 }
  0xac   :  { %v37_v8 = vrot.slane %v36_v7, 1 }
  0xae   :  { %v38_v9 = vadd.f32 %v37_v8, %v36_v7 }
  0xb0   :  { %60 = vpush %v38_v9 }
  0xe1   :  { %s61_s25 = spop %60 }
  0xe2   :  { %s41_s0 = sadd.f32 %s61_s25, %s161_s1 }
  0xe4   :  { %v42_v10 = vstv %s41_s0 }
  0xe5   :  { %44 = vst.msk [vmem:[#allocation6] sm:$0x1] %vm43_vm0, %v42_v10 }
  0xe6   :  { %99 = shalt.err (!%p96_p12)
}
  0xe7   :  { %s100_s4 = scalar_lea.hbm %s162_s2, 16 }
  0xe8   :  { %p101_p13 = scmp.ne.s32.totalorder %s162_s2, %s100_s4  ;;  %p104_p0 = scmp.lt.u32.totalorder %s100_s4, %s162_s2 }
  0xea   :  { %p106_p1 = pnand %p104_p0, %p101_p13 }
  0xec   :  { %109 = shalt.err (!%p106_p1)
}
  0xed   :  { %54 = dma.vmem_to_hbm [thread:$0]  %s52_s24, 16, %s162_s2, [#allocation5]  }
  0xee   :  { %112 = dma.done.wait [#allocation5], 16  }
  0xef   :  { %113 = vsyncadd [#allocation5], 4294967280 }
  0xf0   :  { %58 = vsyncpa [#allocation4], 1 }
  0xf1   :  { %59 = vsyncpa [#allocation5], 1 }

</bundles_post_ra>
